<compile_context>
chip_gen: v7x
topology: tpu7x:2x2x1
jax: 0.10.0
libtpu: 0.0.40
codegen_flags: <defaults>
</compile_context>

<pallas_src>
import jax
import jax.numpy as jnp
from jax import lax
from jax.experimental import pallas as pl
from jax.experimental.pallas import tpu as pltpu


def _round_up(v, m):
    return ((v + m - 1) // m) * m


def _choose_images_per_step(N, HW, max_lanes=8192):
    """Pick B = images per grid step.

    Constraints: B divides N; the lane block width B*HW is a multiple of 128
    (unless a single step covers the whole array); per-step lanes stay under
    `max_lanes` (VMEM budget); prefer >= 2 grid steps (v7x has 2 TensorCores).
    """
    divisors = [b for b in range(1, N + 1) if N % b == 0]
    ok = [b for b in divisors if b == N or (b * HW) % 128 == 0]
    fit = [b for b in ok if b * HW <= max_lanes] or [min(ok)]
    multi = [b for b in fit if N // b >= 2]
    return max(multi) if multi else max(fit)


def _make_block_kernel(W, npix1, npix2):
    """Kernel closure.

    Refs (per grid step, B images packed with stride HW on the lane axis):
      x_ref:  (Cin_p,  B*HW)      packed input planes
      w1_ref: (Cout_p, 9*Cin_p)   conv1 weights, tap-major columns
      b1_ref: (Cout_p, 1)
      w2_ref: (Cout_p, 9*Cout_p)  conv2 weights, tap-major columns
      b2_ref: (Cout_p, 1)
      o_ref:  (Cout_p, B*HW)      packed full-plane outputs (cropped in wrapper)
      h_ref:  (Cout_p, npix1)     VMEM scratch: relu(conv1)
    """
    taps = [dy * W + dx for dy in range(3) for dx in range(3)]

    def kernel(x_ref, w1_ref, b1_ref, w2_ref, b2_ref, o_ref, h_ref):
        b1 = b1_ref[...]                       # (Cout_p, 1) — hoisted once
        b2 = b2_ref[...]

        # ---- conv1: fold 9 taps into K -> ONE dot, N = npix1 (lane-dense) ----
        xs = jnp.concatenate([x_ref[:, s:s + npix1] for s in taps], axis=0)
        h = jnp.dot(w1_ref[...], xs, preferred_element_type=jnp.float32)
        h_ref[...] = jnp.maximum(h + b1, 0.0)           # f32 epilogue (v5e-friendly)

        # ---- conv2: fold 9 taps into K -> ONE dot, N = npix2 ----
        hs = jnp.concatenate([h_ref[:, s:s + npix2] for s in taps], axis=0)
        out = jnp.dot(w2_ref[...], hs, preferred_element_type=jnp.float32)
        # Lanes [npix2, B*HW) belong only to cropped positions of the last image
        # in this block; they are intentionally left unwritten.
        o_ref[:, :npix2] = out + b2

    return kernel


def block_forward_nchw(x_nchw, w1_oihw, b1, w2_oihw, b2):
    """PyTorch-convention forward: NCHW input, OIHW weights.

    Returns (N, Cout, H-4, W-4) float32.
    """
    N, Cin, H, W = x_nchw.shape
    Cout = w1_oihw.shape[0]
    assert H >= 5 and W >= 5, "valid 3x3 conv applied twice needs H,W >= 5"
    HW = H * W
    Ho, Wo = H - 4, W - 4

    Cin_p = _round_up(Cin, 8)       # 8-aligned sublane pieces for the tap concat
    Cout_p = _round_up(Cout, 8)

    B = _choose_images_per_step(N, HW)
    G = N // B
    lanes = B * HW                  # lane width per grid step
    npix1 = lanes - (2 * W + 2)     # conv1 output width (max tap shift = 2W+2)
    npix2 = lanes - 2 * (2 * W + 2)  # conv2 output width

    f32 = jnp.float32
    # Packed input: (Cin_p, N*HW), image n at lanes [n*HW, (n+1)*HW).
    x_lanes = jnp.transpose(x_nchw.reshape(N, Cin, HW), (1, 0, 2)).reshape(Cin, N * HW)
    x_lanes = jnp.pad(x_lanes.astype(f32), ((0, Cin_p - Cin), (0, 0)))

    # Weights: OIHW -> (O, 9*I) with column index (dy*3+dx)*I_p + i (tap-major),
    # matching the sublane order of the in-kernel concatenation.
    w1_p = jnp.pad(w1_oihw.astype(f32),
                   ((0, Cout_p - Cout), (0, Cin_p - Cin), (0, 0), (0, 0)))
    w1_flat = jnp.transpose(w1_p, (0, 2, 3, 1)).reshape(Cout_p, 9 * Cin_p)
    w2_p = jnp.pad(w2_oihw.astype(f32),
                   ((0, Cout_p - Cout), (0, Cout_p - Cout), (0, 0), (0, 0)))
    w2_flat = jnp.transpose(w2_p, (0, 2, 3, 1)).reshape(Cout_p, 9 * Cout_p)
    b1_col = jnp.pad(b1.astype(f32), (0, Cout_p - Cout)).reshape(Cout_p, 1)
    b2_col = jnp.pad(b2.astype(f32), (0, Cout_p - Cout)).reshape(Cout_p, 1)

    kernel = _make_block_kernel(W, npix1, npix2)

    out_flat = pl.pallas_call(
        kernel,
        out_shape=jax.ShapeDtypeStruct((Cout_p, N * HW), jnp.float32),
        grid_spec=pltpu.PrefetchScalarGridSpec(
            num_scalar_prefetch=0,
            grid=(G,),
            in_specs=[
                pl.BlockSpec((Cin_p, lanes), lambda g: (0, g)),
                pl.BlockSpec((Cout_p, 9 * Cin_p), lambda g: (0, 0)),
                pl.BlockSpec((Cout_p, 1), lambda g: (0, 0)),
                pl.BlockSpec((Cout_p, 9 * Cout_p), lambda g: (0, 0)),
                pl.BlockSpec((Cout_p, 1), lambda g: (0, 0)),
            ],
            out_specs=pl.BlockSpec((Cout_p, lanes), lambda g: (0, g)),
            scratch_shapes=[pltpu.VMEM((Cout_p, npix1), jnp.float32)],
        ),
        compiler_params=pltpu.CompilerParams(
            dimension_semantics=("parallel",),
            vmem_limit_bytes=32 * 1024 * 1024),
    )(x_lanes, w1_flat, b1_col, w2_flat, b2_col)

    # Layout plumbing back to the PyTorch output convention + valid-region crop.
    out = out_flat.reshape(Cout_p, N, H, W)[:Cout, :, :Ho, :Wo]
    return jnp.transpose(out, (1, 0, 2, 3))


def _reference_nchw(x_nchw, w1_oihw, b1, w2_oihw, b2):
    dn = lax.conv_dimension_numbers(x_nchw.shape, w1_oihw.shape,
                                    ('NCHW', 'OIHW', 'NCHW'))
    y = lax.conv_general_dilated(x_nchw, w1_oihw, (1, 1), 'VALID',
                                 dimension_numbers=dn)
    y = jnp.maximum(y + b1[None, :, None, None], 0.0)
    y = lax.conv_general_dilated(y, w2_oihw, (1, 1), 'VALID',
                                 dimension_numbers=dn)
    return y + b2[None, :, None, None]


if __name__ == "__main__":
    def run_case(key, N, Cin, Cout, H, W):
        kx, kw1, kb1, kw2, kb2 = jax.random.split(key, 5)
        x = jax.random.normal(kx, (N, Cin, H, W), dtype=jnp.float32)              # NCHW
        w1 = jax.random.normal(kw1, (Cout, Cin, 3, 3), dtype=jnp.float32) * 0.1   # OIHW
        b1 = jax.random.normal(kb1, (Cout,), dtype=jnp.float32) * 0.1
        w2 = jax.random.normal(kw2, (Cout, Cout, 3, 3), dtype=jnp.float32) * 0.1  # OIHW
        b2 = jax.random.normal(kb2, (Cout,), dtype=jnp.float32) * 0.1

        out = jax.block_until_ready(block_forward_nchw(x, w1, b1, w2, b2))
        ref = _reference_nchw(x, w1, b1, w2, b2)
        assert out.shape == (N, Cout, H - 4, W - 4), out.shape
        max_err = float(jnp.max(jnp.abs(out - ref)))
        assert jnp.allclose(out, ref, atol=1e-4, rtol=1e-4), f"max abs err {max_err}"

    key = jax.random.PRNGKey(0)
    k1, k2 = jax.random.split(key)

    # Primary case: Block(in_channels=4, out_channels=8) on 16x16 images.
    run_case(k1, N=2, Cin=4, Cout=8, H=16, W=16)
    # Regression guard (per review): non-square plane, odd channel counts,
    # batched grid step (B=2 images packed per block) to exercise the
    # cross-image contamination / crop invariant.
    run_case(k2, N=4, Cin=5, Cout=6, H=16, W=24)

    print("KERNEL_OK")
</pallas_src>

<mosaic_0001>
module attributes {stable_mosaic.version = 11 : i64} {
  func.func @kernel(%arg0: i32, %arg1: memref<8x256xf32, #tpu.memory_space<vmem>>, %arg2: memref<8x72xf32, #tpu.memory_space<vmem>>, %arg3: memref<8x1xf32, #tpu.memory_space<vmem>>, %arg4: memref<8x72xf32, #tpu.memory_space<vmem>>, %arg5: memref<8x1xf32, #tpu.memory_space<vmem>>, %arg6: memref<8x256xf32, #tpu.memory_space<vmem>>, %arg7: memref<8x222xf32, #tpu.memory_space<vmem>>) attributes {dimension_semantics = [#tpu.dimension_semantics<parallel>], iteration_bounds = array<i64: 2>, scalar_prefetch = 0 : i64, scratch_operands = 1 : i64, tpu.core_type = #tpu.core_type<tc>, window_params = [{transform_indices = @transform_0, window_bounds = array<i64: 8, 256>}, {pipeline_mode = #tpu.pipeline_mode<synchronous>, transform_indices = @transform_1, window_bounds = array<i64: 8, 72>}, {pipeline_mode = #tpu.pipeline_mode<synchronous>, transform_indices = @transform_2, window_bounds = array<i64: 8, 1>}, {pipeline_mode = #tpu.pipeline_mode<synchronous>, transform_indices = @transform_3, window_bounds = array<i64: 8, 72>}, {pipeline_mode = #tpu.pipeline_mode<synchronous>, transform_indices = @transform_4, window_bounds = array<i64: 8, 1>}, {transform_indices = @transform_5, window_bounds = array<i64: 8, 256>}]} {
    %c0 = arith.constant 0 : index
    %c0_0 = arith.constant 0 : index
    %0 = vector.load %arg3[%c0, %c0_0] : memref<8x1xf32, #tpu.memory_space<vmem>>, vector<8x1xf32>
    %c0_1 = arith.constant 0 : index
    %c0_2 = arith.constant 0 : index
    %1 = vector.load %arg5[%c0_1, %c0_2] : memref<8x1xf32, #tpu.memory_space<vmem>>, vector<8x1xf32>
    %c0_3 = arith.constant 0 : index
    %c0_4 = arith.constant 0 : index
    %2 = vector.load %arg1[%c0_3, %c0_4] : memref<8x256xf32, #tpu.memory_space<vmem>>, vector<8x222xf32>
    %c0_5 = arith.constant 0 : index
    %c1 = arith.constant 1 : index
    %3 = vector.load %arg1[%c0_5, %c1] : memref<8x256xf32, #tpu.memory_space<vmem>>, vector<8x222xf32>
    %c0_6 = arith.constant 0 : index
    %c2 = arith.constant 2 : index
    %4 = vector.load %arg1[%c0_6, %c2] : memref<8x256xf32, #tpu.memory_space<vmem>>, vector<8x222xf32>
    %c0_7 = arith.constant 0 : index
    %c16 = arith.constant 16 : index
    %5 = vector.load %arg1[%c0_7, %c16] : memref<8x256xf32, #tpu.memory_space<vmem>>, vector<8x222xf32>
    %c0_8 = arith.constant 0 : index
    %c17 = arith.constant 17 : index
    %6 = vector.load %arg1[%c0_8, %c17] : memref<8x256xf32, #tpu.memory_space<vmem>>, vector<8x222xf32>
    %c0_9 = arith.constant 0 : index
    %c18 = arith.constant 18 : index
    %7 = vector.load %arg1[%c0_9, %c18] : memref<8x256xf32, #tpu.memory_space<vmem>>, vector<8x222xf32>
    %c0_10 = arith.constant 0 : index
    %c32 = arith.constant 32 : index
    %8 = vector.load %arg1[%c0_10, %c32] : memref<8x256xf32, #tpu.memory_space<vmem>>, vector<8x222xf32>
    %c0_11 = arith.constant 0 : index
    %c33 = arith.constant 33 : index
    %9 = vector.load %arg1[%c0_11, %c33] : memref<8x256xf32, #tpu.memory_space<vmem>>, vector<8x222xf32>
    %c0_12 = arith.constant 0 : index
    %c34 = arith.constant 34 : index
    %10 = vector.load %arg1[%c0_12, %c34] : memref<8x256xf32, #tpu.memory_space<vmem>>, vector<8x222xf32>
    %11 = tpu.concatenate %2, %3, %4, %5, %6, %7, %8, %9, %10 in 0 : vector<8x222xf32>, vector<8x222xf32>, vector<8x222xf32>, vector<8x222xf32>, vector<8x222xf32>, vector<8x222xf32>, vector<8x222xf32>, vector<8x222xf32>, vector<8x222xf32> -> vector<72x222xf32>
    %c0_13 = arith.constant 0 : index
    %c0_14 = arith.constant 0 : index
    %12 = vector.load %arg2[%c0_13, %c0_14] : memref<8x72xf32, #tpu.memory_space<vmem>>, vector<8x72xf32>
    %cst = arith.constant dense<0.000000e+00> : vector<8x222xf32>
    %13 = tpu.matmul %12, %11, %cst {dimension_numbers = #tpu.dot_dimension_numbers<[1], [0], [0], [1], [0, 0, 1, 1], [], []>} : vector<8x72xf32>, vector<72x222xf32>, vector<8x222xf32> -> vector<8x222xf32>
    %14 = vector.broadcast %0 : vector<8x1xf32> to vector<8x222xf32>
    %15 = arith.addf %13, %14 : vector<8x222xf32>
    %cst_15 = arith.constant 0.000000e+00 : f32
    %16 = vector.broadcast %cst_15 : f32 to vector<8x222xf32>
    %17 = arith.maximumf %15, %16 : vector<8x222xf32>
    %c0_16 = arith.constant 0 : index
    %c0_17 = arith.constant 0 : index
    %18 = vector.load %arg7[%c0_16, %c0_17] : memref<8x222xf32, #tpu.memory_space<vmem>>, vector<8x222xf32>
    tpu.vector_store %arg7[%c0_16, %c0_17], %17 {strides = array<i32>} : memref<8x222xf32, #tpu.memory_space<vmem>>, vector<8x222xf32>,
    %c0_18 = arith.constant 0 : index
    %c0_19 = arith.constant 0 : index
    %19 = vector.load %arg7[%c0_18, %c0_19] : memref<8x222xf32, #tpu.memory_space<vmem>>, vector<8x188xf32>
    %c0_20 = arith.constant 0 : index
    %c1_21 = arith.constant 1 : index
    %20 = vector.load %arg7[%c0_20, %c1_21] : memref<8x222xf32, #tpu.memory_space<vmem>>, vector<8x188xf32>
    %c0_22 = arith.constant 0 : index
    %c2_23 = arith.constant 2 : index
    %21 = vector.load %arg7[%c0_22, %c2_23] : memref<8x222xf32, #tpu.memory_space<vmem>>, vector<8x188xf32>
    %c0_24 = arith.constant 0 : index
    %c16_25 = arith.constant 16 : index
    %22 = vector.load %arg7[%c0_24, %c16_25] : memref<8x222xf32, #tpu.memory_space<vmem>>, vector<8x188xf32>
    %c0_26 = arith.constant 0 : index
    %c17_27 = arith.constant 17 : index
    %23 = vector.load %arg7[%c0_26, %c17_27] : memref<8x222xf32, #tpu.memory_space<vmem>>, vector<8x188xf32>
    %c0_28 = arith.constant 0 : index
    %c18_29 = arith.constant 18 : index
    %24 = vector.load %arg7[%c0_28, %c18_29] : memref<8x222xf32, #tpu.memory_space<vmem>>, vector<8x188xf32>
    %c0_30 = arith.constant 0 : index
    %c32_31 = arith.constant 32 : index
    %25 = vector.load %arg7[%c0_30, %c32_31] : memref<8x222xf32, #tpu.memory_space<vmem>>, vector<8x188xf32>
    %c0_32 = arith.constant 0 : index
    %c33_33 = arith.constant 33 : index
    %26 = vector.load %arg7[%c0_32, %c33_33] : memref<8x222xf32, #tpu.memory_space<vmem>>, vector<8x188xf32>
    %c0_34 = arith.constant 0 : index
    %c34_35 = arith.constant 34 : index
    %27 = vector.load %arg7[%c0_34, %c34_35] : memref<8x222xf32, #tpu.memory_space<vmem>>, vector<8x188xf32>
    %28 = tpu.concatenate %19, %20, %21, %22, %23, %24, %25, %26, %27 in 0 : vector<8x188xf32>, vector<8x188xf32>, vector<8x188xf32>, vector<8x188xf32>, vector<8x188xf32>, vector<8x188xf32>, vector<8x188xf32>, vector<8x188xf32>, vector<8x188xf32> -> vector<72x188xf32>
    %c0_36 = arith.constant 0 : index
    %c0_37 = arith.constant 0 : index
    %29 = vector.load %arg4[%c0_36, %c0_37] : memref<8x72xf32, #tpu.memory_space<vmem>>, vector<8x72xf32>
    %cst_38 = arith.constant dense<0.000000e+00> : vector<8x188xf32>
    %30 = tpu.matmul %29, %28, %cst_38 {dimension_numbers = #tpu.dot_dimension_numbers<[1], [0], [0], [1], [0, 0, 1, 1], [], []>} : vector<8x72xf32>, vector<72x188xf32>, vector<8x188xf32> -> vector<8x188xf32>
    %31 = vector.broadcast %1 : vector<8x1xf32> to vector<8x188xf32>
    %32 = arith.addf %30, %31 : vector<8x188xf32>
    %c0_39 = arith.constant 0 : index
    %c0_40 = arith.constant 0 : index
    %33 = vector.load %arg6[%c0_39, %c0_40] : memref<8x256xf32, #tpu.memory_space<vmem>>, vector<8x188xf32>
    tpu.vector_store %arg6[%c0_39, %c0_40], %32 {strides = array<i32>} : memref<8x256xf32, #tpu.memory_space<vmem>>, vector<8x188xf32>,
    return
  }
  func.func @transform_0(%arg0: i32) -> (i32, i32) {
    %c0_i32 = arith.constant 0 : i32
    %c0_i32_0 = arith.constant 0 : i32
    return %c0_i32, %arg0 : i32, i32
  }
  func.func @transform_1(%arg0: i32) -> (i32, i32) {
    %c0_i32 = arith.constant 0 : i32
    %c0_i32_0 = arith.constant 0 : i32
    %c0_i32_1 = arith.constant 0 : i32
    return %c0_i32, %c0_i32_0 : i32, i32
  }
  func.func @transform_2(%arg0: i32) -> (i32, i32) {
    %c0_i32 = arith.constant 0 : i32
    %c0_i32_0 = arith.constant 0 : i32
    %c0_i32_1 = arith.constant 0 : i32
    return %c0_i32, %c0_i32_0 : i32, i32
  }
  func.func @transform_3(%arg0: i32) -> (i32, i32) {
    %c0_i32 = arith.constant 0 : i32
    %c0_i32_0 = arith.constant 0 : i32
    %c0_i32_1 = arith.constant 0 : i32
    return %c0_i32, %c0_i32_0 : i32, i32
  }
  func.func @transform_4(%arg0: i32) -> (i32, i32) {
    %c0_i32 = arith.constant 0 : i32
    %c0_i32_0 = arith.constant 0 : i32
    %c0_i32_1 = arith.constant 0 : i32
    return %c0_i32, %c0_i32_0 : i32, i32
  }
  func.func @transform_5(%arg0: i32) -> (i32, i32) {
    %c0_i32 = arith.constant 0 : i32
    %c0_i32_0 = arith.constant 0 : i32
    return %c0_i32, %arg0 : i32, i32
  }
}

</mosaic_0001>

<bundles_post_ra>
// kernel: tpu_custom_call.1
= control target key start
LH: loop header
LB: loop body
LE: loop exit
PB: predicated region body
PF: predicated region fallthrough
CT: control target
= control target key end

     0   :  { %10 = vsyncpa [#allocation4], 0  ;;  %s1158_s0 = inlined_call_operand.hbm [shape: f32[8,512], index: 0, kind: input, shape index: {}]   ;;  %s1159_s1 = inlined_call_operand.vmem [shape: f32[8,72], index: 1, kind: input, shape index: {}]   ;;  %s1160_s2 = inlined_call_operand.vmem [shape: f32[8,1], index: 2, kind: input, shape index: {}]   ;;  %s1161_s3 = inlined_call_operand.vmem [shape: f32[8,72], index: 3, kind: input, shape index: {}]   ;;  %s1162_s4 = inlined_call_operand.vmem [shape: f32[8,1], index: 4, kind: input, shape index: {}]   ;;  %s1163_s5 = inlined_call_operand.hbm [shape: f32[8,512], index: 5, kind: output, shape index: {}]  }
   0x1   :  { %12 = vsyncpa [#allocation4 + $0x1], 0 }
   0x2   :  { %13 = vsyncpa [#allocation5], 0 }
   0x3   :  { %15 = vsyncpa [#allocation5 + $0x1], 0  ;;  %s944_s18 = smov 0   ;;  %s946_s19 = smov 0  }
   0x4   :  { %s948_s20 = smov 0   ;;  %s950_s21 = smov 0  }
   0x5 LB: > { %s965_s22 = sadd.s32 4294967295, %s900_s21   ;;  %s626_s23 = sadd.s32 4294967294, %s900_s21   ;;  %s900_s21 = sphi %s950_s21, %s1178_s21   ;;  %s896_s20 = sphi %s948_s20, %s1177_s20   ;;  %s892_s19 = sphi %s946_s19, %s1176_s19   ;;  %s888_s18 = sphi %s944_s18, %s1175_s18  }
   0x6   : > { %s969_s24 = sadd.s32 1, %s900_s21   ;;  %s28_s25 = sadd.s32 1, %s896_s20 }
   0x7   : > { %s25_s26 = ssub.s32 %s900_s21, %s969_s24  ;;  %p35_p0 = scmp.ne.s32.totalorder %s896_s20, %s892_s19 }
   0x8   : > { %p26_p1 = scmp.eq.s32.totalorder %s25_s26, 0  ;;  %p36_p2 = scmp.eq.s32.totalorder %s900_s21, 0 }
   0x9   : > { %p41_p3 = scmp.ne.s32.totalorder %s892_s19, %s888_s18  ;;  %p42_p4 = scmp.eq.s32.totalorder %s965_s22, 0 }
   0xa   : > { %s981_s27 = scalar_select %p26_p1, %s896_s20, %s28_s25  }
   0xb   : > { %p983_p5 = por %p36_p2, %p35_p0  ;;  %p987_p6 = por %p42_p4, %p41_p3 }
   0xc   : > { %p149_p7 = scmp.eq.s32.totalorder %s965_s22, 1  ;;  %p155_p8 = scmp.eq.s32.totalorder %s626_s23, 1 }
   0xd   : > { %p688_p10 = scmp.lt.s32.totalorder %s900_s21, 2  ;;  %s187_s7 = sand.u32 1, %s896_s20  }
   0xe   : > { %p994_p11 = por %p149_p7, %p35_p0  ;;  %p998_p12 = por %p155_p8, %p41_p3 }
   0xf   : > { %s642_s8 = sshll.u32 %s900_s21, 8  ;;  %s629_s9 = sshll.u32 %s187_s7, 4 }
  0x10   : > { %s1167_s30 = scalar_select %p994_p11, 1, 0 }
  0x11   : > { %s1168_s6 = scalar_select %p998_p12, 1, 0 }
  0x12   : > { %s1007_s12 = scalar_lea.hbm %s1158_s0, %s642_s8  ;;  %s191_s13 = scalar_lea.vmem [#allocation3], %s629_s9 }
  0x13   : > { %s199_s14 = sshll.u32 %s191_s13, 4  ;;  %p1011_p13 = pnand %p688_p10, %p983_p5  ;;  %s1015_s14 = int_to_ptr.vmem [resolvable:$true] %s199_s14 }
  0x14   : > { %s188_s16 = scalar_lea.sflag [#allocation4], %s187_s7  ;;  %s804_s17 = scalar_lea.hbm %s1007_s12, 256 }
  0x15   : > { %p805_p2 = scmp.ne.s32.totalorder %s1007_s12, %s804_s17  ;;  %p806_p3 = pneg %p1011_p13 }
  0x16   : > { %s809_s26 = scalar_lea.hbm %s1158_s0, 512  ;;  %p810_p5 = scmp.lt.u32.totalorder %s1007_s12, %s1158_s0 }
  0x17   : > { %p807_p4 = pnand %p806_p3, %p805_p2  ;;  %p811_p8 = scmp.lt.u32.totalorder %s809_s26, %s804_s17 }
  0x18   : > { %p813_p9 = scmp.lt.u32.totalorder %s804_s17, %s1007_s12 }
  0x19   : > { %p808_p7 = pneg %p807_p4  ;;  %p812_p10 = por %p811_p8, %p810_p5 }
  0x1b   : > { %p814_p0 = por %p813_p9, %p812_p10 }
  0x1d   : > { %p815_p1 = pnand %p814_p0, %p808_p7 }
  0x1f   : > { %818 = shalt.err (!%p815_p1)
}
  0x20   : > { %s819_s7 = scalar_lea.vmem %s1015_s14, 256  ;;  %s902_s9 = smov [#allocation3]  }
  0x21   : > { %p820_p2 = scmp.ne.s32.totalorder %s1015_s14, %s819_s7  ;;  %s824_s10 = sshll.u32 %s902_s9, 4  ;;  %s825_s10 = int_to_ptr.vmem [resolvable:$false] %s824_s10 }
  0x22   : > { %s826_s11 = scalar_lea.vmem %s825_s10, 512  ;;  %p827_p11 = scmp.lt.s32.totalorder %s1015_s14, %s825_s10 }
  0x23   : > { %p822_p4 = pnand %p820_p2, %p806_p3  ;;  %p828_p5 = scmp.lt.s32.totalorder %s826_s11, %s819_s7 }
  0x25   : > { %p823_p12 = pneg %p822_p4  ;;  %p829_p8 = por %p828_p5, %p827_p11 }
  0x27   : > { %p830_p9 = pnand %p829_p8, %p823_p12 }
  0x29   : > { %833 = shalt.err (!%p830_p9)
}
  0x2a   : > { %683 = dma.hbm_to_vmem [thread:$0]  (!%p1011_p13), %s1007_s12, 256, %s1015_s14, %s188_s16  }
  0x2b   : > { %p1170_p0 = scmp.lt.s32.totalorder %s900_s21, 3  ;;  %p1171_p1 = scmp.ge.s32.totalorder %s900_s21, 1 }
  0x2d   : > { %p205_p3 = pnand %p1171_p1, %p1170_p0 }
  0x2e   : > { %s1049_s13 = sand.u32 (!%p205_p3), 1, %s892_s19  }
  0x2f   : > { %208 = sbr.rel (%p205_p3) target bundleno = 788 (0x314), region = 40  ;;  %s633_s17 = sshll.u32 (!%p205_p3), %s1049_s13, 4 }
  0x30   : > { %s211_s23 = scalar_lea.sflag (!%p205_p3), [#allocation4], %s1049_s13  ;;  %s214_s15 = scalar_lea.vmem (!%p205_p3), [#allocation3], %s633_s17 }
  0x36   : > { %879 = dma.done.wait (%p987_p6), %s211_s23, 256  }
  0x37   : > { %881 = vsyncadd (%p987_p6), %s211_s23, 4294967040  ;;  %v245_v0 = vld [vmem:[%s214_s15] sm:$0xff]  ;;  %v246_v1 = vld [vmem:[%s214_s15 + $0x8] sm:$0xff]  ;;  %s903_s12 = smov 127   ;;  %s904_s14 = smov 112   ;;  %v909_v3 = vmov 0.0  }
  0x38   : > { %v732_v2 = vpack.i.bf16 %v246_v1, %v245_v0  ;;  %s905_s16 = smov 126   ;;  %s906_s25 = smov 111   ;;  %387 = vmatprep.mubr.f32.mxu0 %v909_v3  ;;  %531 = vmatprep.mubr.f32.mxu1 %v909_v3  ;;  %v910_v4 = vmov 0   ;;  %v243_v5 = vld [vmem:[%s1160_s2] sm:$0xff]  ;;  %vm253_vm0 = vcmask 1039360   ;;  %vm269_vm1 = vcmask 916480  }
  0x39   : > { %s907_s26 = smov 110   ;;  %s908_s29 = smov 96   ;;  %767 = vset.pattern.permute.xlu1 %v910_v4  ;;  %803 = vset.pattern.permute.xlu0 %v910_v4  ;;  %vm261_vm2 = vcmask 1031168   ;;  %vm277_vm3 = vcmask 908288   ;;  %vm285_vm4 = vcmask 900096   ;;  %vm293_vm5 = vcmask 785408  }
  0x3a   : > { %733 = vrot.lane.b32.xlu0 %v732_v2, %s903_s12  ;;  %743 = vrot.lane.b32.xlu1 %v732_v2, %s904_s14  ;;  %s911_s28 = smov 95   ;;  %s912_s8 = smov 94   ;;  %vm301_vm6 = vcmask 777216   ;;  %vm309_vm7 = vcmask 769024   ;;  %v313_v45 = vld [vmem:[%s1159_s1] sm:$0xff]  ;;  %vm319_vm8 = vcmask 588800  }
  0x3b   : > { %v244_v55 = vld [vmem:[%s1162_s4] sm:$0xff]  ;;  %vm539_vm9 = vcmask 490496   ;;  %p1172_p11 = scmp.ne.s32.totalorder %s1167_s30, 0  ;;  %s913_s7 = smov [#allocation6]  }
  0x3c   : > { %s838_s9 = sshll.u32 %s913_s7, 4  ;;  %s839_s9 = int_to_ptr.vmem [resolvable:$false] %s838_s9 }
  0x3d   : > { %s840_s10 = scalar_lea.vmem %s839_s9, 512 }
  0x3e   : > { %738 = vrot.lane.b32.xlu0 %v732_v2, %s905_s16  ;;  %748 = vrot.lane.b32.xlu1 %v732_v2, %s906_s25 }
  0x42   : > { %753 = vrot.lane.b32.xlu0 %v732_v2, %s907_s26  ;;  %758 = vrot.lane.b32.xlu1 %v732_v2, %s908_s29 }
  0x46   : > { %763 = vrot.lane.b32.xlu0 %v732_v2, %s911_s28  ;;  %305 = vrot.lane.b32.xlu1 %v245_v0, %s912_s8 }
  0x4a   : > { %307 = vrot.lane.b32.xlu0 %v246_v1, %s912_s8  ;;  %316 = vperm.xlu1 %767, %v243_v5  }
  0xac   : > { %v734_v6 = vpop.permute.xlu0 %733  ;;  %v744_v7 = vpop.permute.xlu1 %743 }
  0xad   : > { %v736_v8 = vunpack.i.h.bf16 %v734_v6  ;;  %v735_v9 = vunpack.i.l.bf16 %v734_v6  ;;  %v746_v10 = vunpack.i.h.bf16 %v744_v7  ;;  %v745_v11 = vunpack.i.l.bf16 %v744_v7 }
  0xaf   : > { %v644_v12 = vpack.c.bf16 %v736_v8, %v246_v1  ;;  %v254_v13 = vsel %vm253_vm0, %v735_v9, %v736_v8  ;;  %v270_v17 = vsel %vm269_vm1, %v745_v11, %v746_v10 }
  0xb0   : > { %v739_v14 = vpop.permute.xlu0 %738  ;;  %v646_v15 = vpack.c.bf16 %v254_v13, %v245_v0  ;;  %v749_v16 = vpop.permute.xlu1 %748 }
  0xb1   : > { %v741_v18 = vunpack.i.h.bf16 %v739_v14  ;;  %v740_v19 = vunpack.i.l.bf16 %v739_v14  ;;  %645 = vmatprep.subr.bf16.mxu0 %v644_v12  ;;  %v751_v20 = vunpack.i.h.bf16 %v749_v16  ;;  %v750_v21 = vunpack.i.l.bf16 %v749_v16 }
  0xb2   : > { %647 = vmatpush1.bf16.msra.mxu0 %v646_v15 }
  0xb3   : > { %v648_v22 = vpack.c.bf16 %v746_v10, %v741_v18  ;;  %v262_v23 = vsel %vm261_vm2, %v740_v19, %v741_v18  ;;  %v278_v27 = vsel %vm277_vm3, %v750_v21, %v751_v20 }
  0xb4   : > { %v754_v24 = vpop.permute.xlu0 %753  ;;  %v650_v25 = vpack.c.bf16 %v270_v17, %v262_v23  ;;  %v759_v26 = vpop.permute.xlu1 %758 }
  0xb5   : > { %v756_v28 = vunpack.i.h.bf16 %v754_v24  ;;  %v755_v29 = vunpack.i.l.bf16 %v754_v24  ;;  %649 = vmatprep.subr.bf16.mxu0 %v648_v22  ;;  %v761_v30 = vunpack.i.h.bf16 %v759_v26  ;;  %v760_v31 = vunpack.i.l.bf16 %v759_v26 }
  0xb6   : > { %651 = vmatpush1.bf16.msra.mxu0 %v650_v25 }
  0xb7   : > { %v652_v32 = vpack.c.bf16 %v756_v28, %v751_v20  ;;  %v286_v33 = vsel %vm285_vm4, %v755_v29, %v756_v28  ;;  %v294_v38 = vsel %vm293_vm5, %v760_v31, %v761_v30 }
  0xb8   : > { %v764_v34 = vpop.permute.xlu0 %763  ;;  %v654_v35 = vpack.c.bf16 %v286_v33, %v278_v27  ;;  %v306_v42 = vpop.permute.xlu1 %305 }
  0xb9   : > { %v766_v36 = vunpack.i.h.bf16 %v764_v34  ;;  %v765_v37 = vunpack.i.l.bf16 %v764_v34  ;;  %653 = vmatprep.subr.bf16.mxu0 %v652_v32 }
  0xba   : > { %655 = vmatpush1.bf16.msra.mxu0 %v654_v35 }
  0xbb   : > { %v656_v39 = vpack.c.bf16 %v766_v36, %v761_v30  ;;  %v302_v40 = vsel %vm301_vm6, %v765_v37, %v766_v36  ;;  %v458_v30 = vld [vmem:[%s1161_s3] sm:$0xff] }
  0xbc   : > { %v658_v41 = vpack.c.bf16 %v302_v40, %v294_v38  ;;  %v308_v43 = vpop.permute.xlu0 %307 }
  0xbd   : > { %657 = vmatprep.subr.bf16.mxu0 %v656_v39  ;;  %v310_v44 = vsel %vm309_vm7, %v306_v42, %v308_v43 }
  0xbe   : > { %659 = vmatpush1.bf16.msra.mxu0 %v658_v41 }
  0xbf   : > { %339 = vmatprep.subr.mxu0 %v308_v43 }
  0xc2   : > { %340 = vmatpush1.msra.mxu0 %v310_v44 }
  0xc3   : > { %635 = vmatmul.mubr.msk.f32.vlgmr.msra.gmra.mrb[0].mxu0 %vm319_vm8, %v313_v45 }
  0xc9   : > { %v317_v46 = vpop.permute.xlu1 %316 }
 0x196   : > { %v389_v47 = vpop.f32.mrb[0].mxu0 }
 0x197   : > { %v390_v48 = vadd.f32 %v389_v47, %v317_v46  ;;  %v391_v49 = vpop.f32.mrb[1].mxu0 }
 0x198   : > { %v392_v50 = vadd.f32 %v391_v49, %v317_v46 }
 0x199   : > { %v394_v51 = vmax.f32 %v390_v48, 0.0 }
 0x19a   : > { %v395_v52 = vmax.f32 %v392_v50, 0.0 }
 0x19c   : > { %397 = vst.msk [vmem:[#allocation2 + $0x8] sm:$0xff] %vm309_vm7, %v395_v52 }
 0x1a3   : > { %v399_v53 = vld [vmem:[#allocation2 + $0x8] sm:$0xff] }
 0x1a4   : > { %v773_v54 = vpack.i.bf16 %v399_v53, %v394_v51 }
 0x1a6   : > { %774 = vrot.lane.b32.xlu1 %v773_v54, %s905_s16  ;;  %769 = vrot.lane.b32.xlu0 %v773_v54, %s903_s12  ;;  %s643_s16 = sshll.u32 %s965_s22, 8  ;;  %s542_s22 = scalar_lea.sflag [#allocation5], %s1049_s13 }
 0x1aa   : > { %784 = vrot.lane.b32.xlu1 %v773_v54, %s906_s25  ;;  %779 = vrot.lane.b32.xlu0 %v773_v54, %s904_s14  ;;  %s240_s25 = scalar_lea.vmem [#allocation6], %s633_s17 }
 0x1ae   : > { %794 = vrot.lane.b32.xlu1 %v773_v54, %s908_s29  ;;  %789 = vrot.lane.b32.xlu0 %v773_v54, %s907_s26  ;;  %s556_s26 = sshll.u32 %s240_s25, 4  ;;  %s1116_s26 = int_to_ptr.vmem [resolvable:$true] %s556_s26 }
 0x1af   : > { %s834_s17 = scalar_lea.vmem %s1116_s26, 256  ;;  %p841_p7 = scmp.lt.s32.totalorder %s1116_s26, %s839_s9 }
 0x1b0   : > { %p835_p6 = scmp.ne.s32.totalorder %s1116_s26, %s834_s17  ;;  %p842_p10 = scmp.lt.s32.totalorder %s840_s10, %s834_s17 }
 0x1b2   : > { %451 = vrot.lane.b32.xlu1 %v394_v51, %s912_s8  ;;  %799 = vrot.lane.b32.xlu0 %v773_v54, %s911_s28  ;;  %p836_p12 = pnand %p835_p6, %p1172_p11  ;;  %p843_p2 = por %p842_p10, %p841_p7 }
 0x1b4   : > { %p837_p13 = pneg %p836_p12 }
 0x1b6   : > { %461 = vperm.xlu1 %767, %v244_v55   ;;  %453 = vrot.lane.b32.xlu0 %v399_v53, %s912_s8  ;;  %s1114_s8 = scalar_lea.hbm %s1163_s5, %s643_s16  ;;  %p844_p4 = pnand %p843_p2, %p837_p13 }
 0x218   : > { %v775_v56 = vpop.permute.xlu1 %774  ;;  %v770_v57 = vpop.permute.xlu0 %769 }
 0x219   : > { %v772_v58 = vunpack.i.h.bf16 %v770_v57  ;;  %v771_v59 = vunpack.i.l.bf16 %v770_v57  ;;  %v777_v60 = vunpack.i.h.bf16 %v775_v56  ;;  %v776_v61 = vunpack.i.l.bf16 %v775_v56 }
 0x21b   : > { %v660_v62 = vpack.c.bf16 %v772_v58, %v399_v53  ;;  %v406_v63 = vsel %vm253_vm0, %v771_v59, %v772_v58  ;;  %v413_v8 = vsel %vm261_vm2, %v776_v61, %v777_v60 }
 0x21c   : > { %v785_v0 = vpop.permute.xlu1 %784  ;;  %v780_v1 = vpop.permute.xlu0 %779  ;;  %v662_v2 = vpack.c.bf16 %v406_v63, %v394_v51 }
 0x21d   : > { %v782_v3 = vunpack.i.h.bf16 %v780_v1  ;;  %v781_v4 = vunpack.i.l.bf16 %v780_v1  ;;  %661 = vmatprep.subr.bf16.mxu1 %v660_v62  ;;  %v787_v5 = vunpack.i.h.bf16 %v785_v0  ;;  %v786_v6 = vunpack.i.l.bf16 %v785_v0 }
 0x21e   : > { %663 = vmatpush1.bf16.msra.mxu1 %v662_v2 }
 0x21f   : > { %v664_v7 = vpack.c.bf16 %v782_v3, %v777_v60  ;;  %v420_v9 = vsel %vm269_vm1, %v781_v4, %v782_v3  ;;  %v427_v15 = vsel %vm277_vm3, %v786_v6, %v787_v5 }
 0x220   : > { %v795_v10 = vpop.permute.xlu1 %794  ;;  %v790_v11 = vpop.permute.xlu0 %789  ;;  %v666_v12 = vpack.c.bf16 %v420_v9, %v413_v8 }
 0x221   : > { %v792_v13 = vunpack.i.h.bf16 %v790_v11  ;;  %v791_v14 = vunpack.i.l.bf16 %v790_v11  ;;  %665 = vmatprep.subr.bf16.mxu1 %v664_v7  ;;  %v797_v16 = vunpack.i.h.bf16 %v795_v10  ;;  %v796_v17 = vunpack.i.l.bf16 %v795_v10 }
 0x222   : > { %667 = vmatpush1.bf16.msra.mxu1 %v666_v12 }
 0x223   : > { %v668_v18 = vpack.c.bf16 %v792_v13, %v787_v5  ;;  %v434_v19 = vsel %vm285_vm4, %v791_v14, %v792_v13  ;;  %v441_v25 = vsel %vm293_vm5, %v796_v17, %v797_v16 }
 0x224   : > { %v800_v20 = vpop.permute.xlu0 %799  ;;  %v670_v21 = vpack.c.bf16 %v434_v19, %v427_v15  ;;  %v452_v29 = vpop.permute.xlu1 %451 }
 0x225   : > { %v802_v22 = vunpack.i.h.bf16 %v800_v20  ;;  %v801_v23 = vunpack.i.l.bf16 %v800_v20  ;;  %669 = vmatprep.subr.bf16.mxu1 %v668_v18 }
 0x226   : > { %671 = vmatpush1.bf16.msra.mxu1 %v670_v21 }
 0x227   : > { %v672_v24 = vpack.c.bf16 %v802_v22, %v797_v16  ;;  %v448_v26 = vsel %vm301_vm6, %v801_v23, %v802_v22 }
 0x228   : > { %v674_v27 = vpack.c.bf16 %v448_v26, %v441_v25  ;;  %v454_v28 = vpop.permute.xlu0 %453 }
 0x229   : > { %673 = vmatprep.subr.bf16.mxu1 %v672_v24  ;;  %v455_v31 = vsel %vm309_vm7, %v452_v29, %v454_v28 }
 0x22a   : > { %675 = vmatpush1.bf16.msra.mxu1 %v674_v27 }
 0x22b   : > { %483 = vmatprep.subr.mxu1 %v454_v28 }
 0x22e   : > { %484 = vmatpush1.msra.mxu1 %v455_v31 }
 0x22f   : > { %636 = vmatmul.mubr.msk.f32.vlgmr.msra.gmra.mrb[0].mxu1 %vm319_vm8, %v458_v30 }
 0x235   : > { %v462_v32 = vpop.permute.xlu1 %461 }
 0x302   : > { %v533_v33 = vpop.f32.mrb[0].mxu1 }
 0x303   : > { %v534_v34 = vadd.f32 %v533_v33, %v462_v32  ;;  %v535_v35 = vpop.f32.mrb[1].mxu1 }
 0x304   : > { %v536_v36 = vadd.f32 %v535_v35, %v462_v32 }
 0x305   : > { %538 = vst [vmem:[%s240_s25] sm:$0xff] %v534_v34 }
 0x306   : > { %540 = vst.msk [vmem:[%s240_s25 + $0x8] sm:$0xff] %vm539_vm9, %v536_v36 }
 0x307   : > { %847 = shalt.err (!%p844_p4)
}
 0x308   : > { %s848_s13 = scalar_lea.hbm %s1114_s8, 256  ;;  %s852_s15 = scalar_lea.hbm %s1163_s5, 512 }
 0x309   : > { %p849_p5 = scmp.ne.s32.totalorder %s1114_s8, %s848_s13  ;;  %p853_p0 = scmp.lt.u32.totalorder %s1114_s8, %s1163_s5 }
 0x30a   : > { %p854_p1 = scmp.lt.u32.totalorder %s852_s15, %s848_s13  ;;  %p856_p6 = scmp.lt.u32.totalorder %s848_s13, %s1114_s8 }
 0x30b   : > { %p850_p8 = pnand %p849_p5, %p1172_p11 }
 0x30c   : > { %p855_p3 = por %p854_p1, %p853_p0 }
 0x30d   : > { %p851_p9 = pneg %p850_p8 }
 0x30e   : > { %p857_p12 = por %p856_p6, %p855_p3 }
 0x310   : > { %p858_p13 = pnand %p857_p12, %p851_p9 }
 0x312   : > { %861 = shalt.err (!%p858_p13)
}
 0x313   : > { %678 = dma.vmem_to_hbm [thread:$0]  (%p1172_p11), %s1116_s26, 256, %s1114_s8, %s542_s22  }
 0x314 PF: > { %s568_s16 = sand.u32 1, %s888_s18   ;;  %p1173_p7 = scmp.ne.s32.totalorder %s1168_s6, 0 }
 0x315   : > { %p1174_p10 = scmp.ge.s32.totalorder %s900_s21, 2  ;;  %s569_s25 = scalar_lea.sflag [#allocation5], %s568_s16 }
 0x317   : > { %p685_p2 = pnand %p1174_p10, %p1173_p7 }
 0x319   : > { %883 = dma.done.wait (!%p685_p2), %s569_s25, 256  }
 0x31a   : > { %885 = vsyncadd (!%p685_p2), %s569_s25, 4294967040  ;;  %p18_p4 = scmp.ge.s32.totalorder %s969_s24, 4   ;;  %s1175_s18 = smov %s892_s19 }
 0x31b   : > { %s1176_s19 = smov %s896_s20  ;;  %s1177_s20 = smov %s981_s27 }
 0x31c   : > { %s1178_s21 = smov %s969_s24  ;;  %20 = sbr.rel (!%p18_p4) target bundleno = 5 (0x5), region = 85 }
 0x323   :  { %574 = vsyncpa [#allocation4], 1 }
 0x324   :  { %576 = vsyncpa [#allocation4 + $0x1], 1 }
 0x325   :  { %577 = vsyncpa [#allocation5], 1 }
 0x326   :  { %579 = vsyncpa [#allocation5 + $0x1], 1 }

</bundles_post_ra>
